<compile_context>
chip_gen: v6e
topology: v6e:2x2x1
jax: 0.10.0
libtpu: 0.0.40
codegen_flags: <defaults>
</compile_context>

<pallas_src>
from functools import partial

import jax
import jax.numpy as jnp
from jax.experimental import pallas as pl
from jax.experimental.pallas import tpu as pltpu


def _round_up(x: int, m: int) -> int:
    return ((x + m - 1) // m) * m


def _cdiv(a: int, b: int) -> int:
    return -(-a // b)


def _vmem_capacity_bytes() -> int:
    """Physical VMEM per TensorCore (v5e/v6e: 128 MiB, v7x: 64 MiB)."""
    try:
        info = pltpu.get_tpu_info()
        for name in ("vmem_capacity_bytes", "vmem_bytes"):
            v = getattr(info, name, None)
            if v:
                return int(v)
    except Exception:
        pass
    return 64 << 20  # conservative fallback (v7x per-TC)


def _make_pool_head_kernel(hw: int, hw_tile: int, n_chunks: int):
    """Fused global-average-pool + linear head.

    x_ref  : (n_tile, C, hw_tile)  streamed image block (input dtype)
    w_ref  : (C, K_pad)            weight with 1/(H*W) folded in, f32
    b_ref  : (1, K_pad)            bias, f32
    o_ref  : (n_tile, K_pad)       logits (written only at the last HW step)
    acc_ref: (n_tile, C, 128)      lane-dense f32 partial-sum scratch
    """
    tail = hw % hw_tile  # > 0 only when the last HW block is partial (unpadded x)

    def kernel(x_ref, w_ref, b_ref, o_ref, acc_ref):
        s = pl.program_id(1)

        @pl.when(s == 0)
        def _():
            acc_ref[...] = jnp.zeros_like(acc_ref)

        # Static 128-wide chunk adds into the lane-dense scratch: per-step work
        # is VPU adds + full-width stores; the single cross-lane reduction is
        # deferred to the finalize block below (once per image tile).
        for j in range(n_chunks):
            lo = j * 128
            width = min(128, hw_tile - lo)
            chunk = x_ref[:, :, lo:lo + width].astype(jnp.float32)
            if tail and lo + width > tail:
                # This chunk can run past the true HW extent on the last HW
                # step (x is NOT padded in HBM); zero the out-of-bounds lanes.
                lane = jax.lax.broadcasted_iota(jnp.int32, chunk.shape, 2)
                idx = s * hw_tile + lo + lane
                chunk = jnp.where(idx < hw, chunk, 0.0)
            if width == 128:
                acc_ref[...] += chunk
            else:
                acc_ref[:, :, :width] += chunk

        @pl.when(s == pl.num_programs(1) - 1)
        def _():
            pooled = jnp.sum(acc_ref[...], axis=-1)            # (n_tile, C) f32
            logits = jnp.dot(pooled, w_ref[...],
                             preferred_element_type=jnp.float32)
            o_ref[...] = (logits + b_ref[...]).astype(o_ref.dtype)

    return kernel


def _plan_tiles(n, c, hw, hw_tile_max, x_block_budget, split_batch):
    """Pick (n_tile, n_steps, hw_tile, hw_steps); budget is f32-equiv VMEM."""
    c_pad4 = _round_up(c, 8) * 4            # VMEM cost per (image, lane) column
    # Grow the lane (HW) tile first: lane-dense blocks, fewest reduction steps,
    # and it keeps n_tile (and the acc scratch) small.
    lane_cap = max(128, min(hw_tile_max, max(128, x_block_budget // c_pad4))
                   // 128 * 128)
    if hw <= lane_cap:
        hw_tile, hw_steps = hw, 1           # full-extent block, no tail mask
    else:
        hw_tile, hw_steps = lane_cap, _cdiv(hw, lane_cap)
    per_img = c_pad4 * hw_tile
    n_fit = max(1, x_block_budget // per_img)
    if n_fit >= n:
        n_tile, n_steps = n, 1
    else:
        n_tile = max(8, n_fit // 8 * 8)     # 8-aligned output blocks
        n_steps = _cdiv(n, n_tile)
    # Keep the parallel grid axis >= 2 when the batch allows it so both
    # TensorCores get work on v7x (a few extra grid steps elsewhere: harmless).
    if split_batch and n_steps == 1 and n >= 16:
        n_tile = _round_up(_cdiv(n, 2), 8)
        n_steps = _cdiv(n, n_tile)
    return n_tile, n_steps, hw_tile, hw_steps


def _vmem_estimate(n_tile, c, hw_tile, kp):
    c_pad = _round_up(c, 8)
    x_blk = n_tile * c_pad * hw_tile * 4                # f32-equiv upper bound
    out_blk = n_tile * kp * 4
    consts = (c_pad + 8) * kp * 4
    acc = n_tile * c_pad * 128 * 4
    # double-buffered streams + scratch + chunk/mask temporaries + headroom
    return 2 * x_blk + 3 * out_blk + 2 * consts + 5 * acc + (2 << 20)


@partial(jax.jit, static_argnames=("num_classes", "hw_tile_max",
                                   "x_block_budget", "vmem_cap", "split_batch"))
def _pooled_linear_forward(img, weight, bias, *, num_classes, hw_tile_max,
                           x_block_budget, vmem_cap, split_batch):
    n, c, h, w = img.shape
    hw = h * w
    kp = _round_up(num_classes, 128)                    # lane-dense logits

    # Generation-aware VMEM plan: never request more than 3/4 of physical VMEM
    # (48 MiB on v7x, 96 MiB on v5e/v6e).  If the estimate would not fit,
    # shrink the tile plan rather than silently clamping the limit.
    cap_limit = (vmem_cap * 3) // 4
    budget = max(1 << 20, x_block_budget)
    for _ in range(8):
        n_tile, n_steps, hw_tile, hw_steps = _plan_tiles(
            n, c, hw, hw_tile_max, budget, split_batch)
        need = _vmem_estimate(n_tile, c, hw_tile, kp)
        if need <= cap_limit or budget <= (1 << 20):
            break
        budget //= 2
    vmem_limit = int(min(max(need, 16 << 20), cap_limit))

    # No wrapper-side pad/copy of x: the (N,C,H,W)->(N,C,HW) reshape is free,
    # the HW tail is masked in-kernel, and the batch tail only produces output
    # rows that are sliced away below.
    x3 = img.reshape(n, c, hw)

    # Tiny resident head constants (constant index_map -> DMA'd once).
    w_scaled = jnp.pad(weight.astype(jnp.float32) * (1.0 / float(hw)),
                       ((0, 0), (0, kp - num_classes)))
    b_pad = jnp.pad(bias.astype(jnp.float32), ((0, 0), (0, kp - num_classes)))

    kernel = _make_pool_head_kernel(hw, hw_tile, _cdiv(hw_tile, 128))

    out = pl.pallas_call(
        kernel,
        out_shape=jax.ShapeDtypeStruct((n_steps * n_tile, kp), jnp.float32),
        grid_spec=pltpu.PrefetchScalarGridSpec(
            num_scalar_prefetch=0,
            grid=(n_steps, hw_steps),                   # reduction axis last
            in_specs=[
                # streamed input, tiled over (image-tile, HW-tile)
                pl.BlockSpec((n_tile, c, hw_tile), lambda i, s: (i, 0, s)),
                # head constants: same block every step -> resident in VMEM
                # (~KB each now, so double- vs single-buffering is irrelevant)
                pl.BlockSpec((c, kp), lambda i, s: (0, 0)),
                pl.BlockSpec((1, kp), lambda i, s: (0, 0)),
            ],
            out_specs=pl.BlockSpec((n_tile, kp), lambda i, s: (i, 0)),
            scratch_shapes=[pltpu.VMEM((n_tile, c, 128), jnp.float32)],
        ),
        compiler_params=pltpu.CompilerParams(
            dimension_semantics=("parallel", "arbitrary"),
            vmem_limit_bytes=vmem_limit,
        ),
    )(x3, w_scaled, b_pad)
    return out[:n, :num_classes]


class BaseClassifierPallas:
    """Mirrors BaseClassifier.forward dispatch; simple_test (pool + head) is
    one fused, software-pipelined Pallas kernel."""

    def __init__(self, in_channels: int, num_classes: int,
                 hw_tile_max: int = 2048, x_block_budget=None,
                 split_batch: bool = True):
        c, k = in_channels, num_classes
        # Deterministic synthetic parameters (no checkpoint loading).
        self.weight = (jnp.arange(c * k, dtype=jnp.float32).reshape(c, k)
                       / float(c * k) - 0.5)
        self.bias = jnp.arange(k, dtype=jnp.float32).reshape(1, k) * 0.01
        self.in_channels = c
        self.num_classes = k
        self.hw_tile_max = int(hw_tile_max)
        vmem_cap = _vmem_capacity_bytes()
        if x_block_budget is None:
            # ~10 MiB x blocks on 64 MiB parts (v7x), ~21 MiB on 128 MiB parts
            # (v5e/v6e): the ~0.35us/step overhead stays <10% of per-step DMA.
            x_block_budget = min(32 << 20, max(8 << 20, vmem_cap // 6))
        self.x_block_budget = int(x_block_budget)
        self.vmem_cap = int(vmem_cap)
        self.split_batch = bool(split_batch)
        self.fp16_enabled = False

    # --- extract_feat + head, fused in one tiled pallas_call ----------------
    def simple_test(self, img, **kwargs):
        assert img.shape[1] == self.in_channels
        return _pooled_linear_forward(
            img, self.weight, self.bias,
            num_classes=self.num_classes, hw_tile_max=self.hw_tile_max,
            x_block_budget=self.x_block_budget, vmem_cap=self.vmem_cap,
            split_batch=self.split_batch)

    def aug_test(self, imgs, **kwargs):
        if isinstance(imgs, (list, tuple)):
            views = list(imgs)
            if len(views) == 1:
                return self.simple_test(views[0], **kwargs)
            # Each TTA view is streamed by its own pallas_call (one minimal
            # HBM pass per view) instead of paying an extra full-HBM
            # concatenate copy before a single big call.
            logits = jnp.stack([self.simple_test(v, **kwargs) for v in views])
            return jnp.mean(logits, axis=0)
        # Pre-stacked (A, N, C, H, W): fold the view axis into the batch axis
        # (free reshape) -> ONE pallas_call over all views.
        a, n = imgs.shape[0], imgs.shape[1]
        logits = self.simple_test(imgs.reshape((a * n,) + imgs.shape[2:]),
                                  **kwargs)
        return jnp.mean(logits.reshape(a, n, self.num_classes), axis=0)

    def forward_test(self, imgs, **kwargs):
        if not isinstance(imgs, (list, tuple)):
            imgs = [imgs]
        if len(imgs) == 1:
            return self.simple_test(imgs[0], **kwargs)
        return self.aug_test(list(imgs), **kwargs)

    def forward_train(self, imgs, **kwargs):
        # TODO(synk): forward_train / loss heads are abstract in BaseClassifier
        # (only concrete subclasses define them); not implemented here.
        raise NotImplementedError("forward_train is abstract in BaseClassifier")

    def forward(self, img, return_loss=True, **kwargs):
        if return_loss:
            return self.forward_train(img, **kwargs)
        return self.forward_test(img, **kwargs)

    __call__ = forward


def _reference_forward(x, weight, bias):
    n, c, h, w = x.shape
    pooled = jnp.mean(x.astype(jnp.float32).reshape(n, c, h * w), axis=-1)
    return jnp.dot(pooled, weight, precision=jax.lax.Precision.HIGHEST) + bias


if __name__ == "__main__":
    key = jax.random.PRNGKey(0)
    N, C, H, W = 2, 4, 16, 16
    num_classes = 8
    x = jax.random.normal(key, (N, C, H, W), dtype=jnp.float32)

    # hw_tile_max=128 forces 2 HW reduction steps on this toy input.
    model = BaseClassifierPallas(C, num_classes, hw_tile_max=128)
    logits = jax.block_until_ready(model(x, return_loss=False))
    ref = _reference_forward(x, model.weight, model.bias)
    assert logits.shape == (N, num_classes)
    assert jnp.allclose(logits, ref, atol=1e-3, rtol=1e-3)

    # Default config: single full-extent HW block (no reduction steps).
    model_big = BaseClassifierPallas(C, num_classes)
    logits1 = jax.block_until_ready(model_big(x, return_loss=False))
    assert jnp.allclose(logits1, ref, atol=1e-3, rtol=1e-3)

    # HW=192 does not divide the 128-lane tile -> exercises in-kernel tail
    # masking (this replaced the old wrapper-side jnp.pad copy of x).
    x_odd = jax.random.normal(jax.random.PRNGKey(2), (N, C, 16, 12),
                              dtype=jnp.float32)
    logits_odd = jax.block_until_ready(model(x_odd, return_loss=False))
    ref_odd = _reference_forward(x_odd, model.weight, model.bias)
    assert jnp.allclose(logits_odd, ref_odd, atol=1e-3, rtol=1e-3)

    # bf16 streaming of x (half the HBM bytes moved); accumulation stays f32.
    xb = x.astype(jnp.bfloat16)
    logits_bf16 = jax.block_until_ready(model(xb, return_loss=False))
    ref_bf16 = _reference_forward(xb, model.weight, model.bias)
    assert jnp.allclose(logits_bf16, ref_bf16, atol=1e-3, rtol=1e-3)

    # Batch split into two image tiles (keeps both v7x TensorCores busy) with a
    # partial trailing batch block handled by the output slice.
    x_big = jax.random.normal(jax.random.PRNGKey(3), (18, C, 16, 16),
                              dtype=jnp.float32)
    logits_big = jax.block_until_ready(model_big(x_big, return_loss=False))
    ref_big = _reference_forward(x_big, model_big.weight, model_big.bias)
    assert logits_big.shape == (18, num_classes)
    assert jnp.allclose(logits_big, ref_big, atol=1e-3, rtol=1e-3)

    # aug_test: list of TTA views (no concatenate copy) and pre-stacked views.
    x_aug = jax.random.normal(jax.random.PRNGKey(1), (N, C, H, W),
                              dtype=jnp.float32)
    ref_aug = 0.5 * (ref + _reference_forward(x_aug, model.weight, model.bias))
    aug_logits = jax.block_until_ready(model([x, x_aug], return_loss=False))
    assert aug_logits.shape == (N, num_classes)
    assert jnp.allclose(aug_logits, ref_aug, atol=1e-3, rtol=1e-3)
    stacked = jnp.stack([x, x_aug], axis=0)              # (A, N, C, H, W)
    aug_logits2 = jax.block_until_ready(model.aug_test(stacked))
    assert jnp.allclose(aug_logits2, ref_aug, atol=1e-3, rtol=1e-3)

    print("KERNEL_OK")
</pallas_src>

<mosaic_0001>
module attributes {stable_mosaic.version = 11 : i64} {
  func.func @kernel(%arg0: i32, %arg1: i32, %arg2: memref<2x4x128xf32, #tpu.memory_space<vmem>>, %arg3: memref<4x128xf32, #tpu.memory_space<vmem>>, %arg4: memref<1x128xf32, #tpu.memory_space<vmem>>, %arg5: memref<2x128xf32, #tpu.memory_space<vmem>>, %arg6: memref<2x4x128xf32, #tpu.memory_space<vmem>>) attributes {dimension_semantics = [#tpu.dimension_semantics<parallel>, #tpu.dimension_semantics<arbitrary>], iteration_bounds = array<i64: 1, 2>, scalar_prefetch = 0 : i64, scratch_operands = 1 : i64, tpu.core_type = #tpu.core_type<tc>, window_params = [{transform_indices = @transform_0, window_bounds = array<i64: 2, 4, 128>}, {pipeline_mode = #tpu.pipeline_mode<synchronous>, transform_indices = @transform_1, window_bounds = array<i64: 4, 128>}, {pipeline_mode = #tpu.pipeline_mode<synchronous>, transform_indices = @transform_2, window_bounds = array<i64: 1, 128>}, {transform_indices = @transform_3, window_bounds = array<i64: 2, 128>}]} {
    %c0_i32 = arith.constant 0 : i32
    %0 = arith.cmpi eq, %arg1, %c0_i32 : i32
    %1 = arith.extui %0 : i1 to i32
    %c0_i32_0 = arith.constant 0 : i32
    %2 = arith.cmpi ne, %1, %c0_i32_0 : i32
    scf.if %2 {
      %cst = arith.constant 0.000000e+00 : f32
      %10 = vector.broadcast %cst : f32 to vector<2x4x128xf32>
      %c0_10 = arith.constant 0 : index
      %c0_11 = arith.constant 0 : index
      %c0_12 = arith.constant 0 : index
      %11 = vector.load %arg6[%c0_10, %c0_11, %c0_12] : memref<2x4x128xf32, #tpu.memory_space<vmem>>, vector<2x4x128xf32>
      tpu.vector_store %arg6[%c0_10, %c0_11, %c0_12], %10 {strides = array<i32>} : memref<2x4x128xf32, #tpu.memory_space<vmem>>, vector<2x4x128xf32>,
    } else {
    }
    %c0 = arith.constant 0 : index
    %c0_1 = arith.constant 0 : index
    %c0_2 = arith.constant 0 : index
    %3 = vector.load %arg2[%c0, %c0_1, %c0_2] : memref<2x4x128xf32, #tpu.memory_space<vmem>>, vector<2x4x128xf32>
    %c0_3 = arith.constant 0 : index
    %c0_4 = arith.constant 0 : index
    %c0_5 = arith.constant 0 : index
    %4 = vector.load %arg6[%c0_3, %c0_4, %c0_5] : memref<2x4x128xf32, #tpu.memory_space<vmem>>, vector<2x4x128xf32>
    %5 = arith.addf %4, %3 : vector<2x4x128xf32>
    %c0_6 = arith.constant 0 : index
    %c0_7 = arith.constant 0 : index
    %c0_8 = arith.constant 0 : index
    %6 = vector.load %arg6[%c0_6, %c0_7, %c0_8] : memref<2x4x128xf32, #tpu.memory_space<vmem>>, vector<2x4x128xf32>
    tpu.vector_store %arg6[%c0_6, %c0_7, %c0_8], %5 {strides = array<i32>} : memref<2x4x128xf32, #tpu.memory_space<vmem>>, vector<2x4x128xf32>,
    %c1_i32 = arith.constant 1 : i32
    %7 = arith.cmpi eq, %arg1, %c1_i32 : i32
    %8 = arith.extui %7 : i1 to i32
    %c0_i32_9 = arith.constant 0 : i32
    %9 = arith.cmpi ne, %8, %c0_i32_9 : i32
    scf.if %9 {
      %c0_10 = arith.constant 0 : index
      %c0_11 = arith.constant 0 : index
      %c0_12 = arith.constant 0 : index
      %10 = vector.load %arg6[%c0_10, %c0_11, %c0_12] : memref<2x4x128xf32, #tpu.memory_space<vmem>>, vector<2x4x128xf32>
      %cst = arith.constant dense<0.000000e+00> : vector<2x4xf32>
      %11 = vector.multi_reduction <add>, %10, %cst [2] : vector<2x4x128xf32> to vector<2x4xf32>
      %c0_13 = arith.constant 0 : index
      %c0_14 = arith.constant 0 : index
      %12 = vector.load %arg3[%c0_13, %c0_14] : memref<4x128xf32, #tpu.memory_space<vmem>>, vector<4x128xf32>
      %cst_15 = arith.constant dense<0.000000e+00> : vector<2x128xf32>
      %13 = tpu.matmul %11, %12, %cst_15 {dimension_numbers = #tpu.dot_dimension_numbers<[1], [0], [0], [1], [0, 0, 1, 1], [], []>} : vector<2x4xf32>, vector<4x128xf32>, vector<2x128xf32> -> vector<2x128xf32>
      %c0_16 = arith.constant 0 : index
      %c0_17 = arith.constant 0 : index
      %14 = vector.load %arg4[%c0_16, %c0_17] : memref<1x128xf32, #tpu.memory_space<vmem>>, vector<1x128xf32>
      %15 = vector.broadcast %14 : vector<1x128xf32> to vector<2x128xf32>
      %16 = arith.addf %13, %15 : vector<2x128xf32>
      %c0_18 = arith.constant 0 : index
      %c0_19 = arith.constant 0 : index
      %17 = vector.load %arg5[%c0_18, %c0_19] : memref<2x128xf32, #tpu.memory_space<vmem>>, vector<2x128xf32>
      tpu.vector_store %arg5[%c0_18, %c0_19], %16 {strides = array<i32>} : memref<2x128xf32, #tpu.memory_space<vmem>>, vector<2x128xf32>,
    } else {
    }
    return
  }
  func.func @transform_0(%arg0: i32, %arg1: i32) -> (i32, i32, i32) {
    %c0_i32 = arith.constant 0 : i32
    %c0_i32_0 = arith.constant 0 : i32
    return %arg0, %c0_i32, %arg1 : i32, i32, i32
  }
  func.func @transform_1(%arg0: i32, %arg1: i32) -> (i32, i32) {
    %c0_i32 = arith.constant 0 : i32
    %c0_i32_0 = arith.constant 0 : i32
    %c0_i32_1 = arith.constant 0 : i32
    return %c0_i32, %c0_i32_0 : i32, i32
  }
  func.func @transform_2(%arg0: i32, %arg1: i32) -> (i32, i32) {
    %c0_i32 = arith.constant 0 : i32
    %c0_i32_0 = arith.constant 0 : i32
    %c0_i32_1 = arith.constant 0 : i32
    return %c0_i32, %c0_i32_0 : i32, i32
  }
  func.func @transform_3(%arg0: i32, %arg1: i32) -> (i32, i32) {
    %c0_i32 = arith.constant 0 : i32
    %c0_i32_0 = arith.constant 0 : i32
    return %arg0, %c0_i32 : i32, i32
  }
}

</mosaic_0001>

<bundles_post_ra>
// kernel: _pooled_linear_forward.1
= control target key start
LH: loop header
LB: loop body
LE: loop exit
PB: predicated region body
PF: predicated region fallthrough
CT: control target
= control target key end

     0   :  { %8 = vsyncpa [#allocation5], 0  ;;  %s585_s12 = smov 0   ;;  %s587_s13 = smov 0   ;;  %s672_s0 = inlined_call_operand.vmem [shape: f32[2,4,256], index: 0, kind: input, shape index: {}]   ;;  %s673_s1 = inlined_call_operand.vmem [shape: f32[4,128], index: 1, kind: input, shape index: {}]   ;;  %s674_s2 = inlined_call_operand.vmem [shape: f32[1,128], index: 2, kind: input, shape index: {}]   ;;  %s675_s3 = inlined_call_operand.hbm [shape: f32[2,128], index: 3, kind: output, shape index: {}]  }
   0x1   :  { %s589_s14 = smov 0   ;;  %s591_s15 = smov 0  }
   0x2   :  { %s593_s16 = smov 0  }
   0x3 LB: > { %s420_s17 = sadd.s32 4294967295, %s559_s16   ;;  %s23_s18 = sadd.s32 1, %s555_s15  ;;  %s559_s16 = sphi %s593_s16, %s14_s16   ;;  %s555_s15 = sphi %s591_s15, %s680_s15   ;;  %s551_s14 = sphi %s589_s14, %s679_s14   ;;  %s547_s13 = sphi %s587_s13, %s678_s13   ;;  %s543_s12 = sphi %s585_s12, %s677_s12  }
   0x4   : > { %p24_p0 = scmp.ge.s32.totalorder %s23_s18, 2  ;;  %p42_p1 = scmp.ne.s32.totalorder %s547_s13, %s543_s12 }
   0x5   : > { %p43_p2 = scmp.eq.s32.totalorder %s559_s16, 0  ;;  %s35_s20 = sadd.s32 1, %s547_s13 }
   0x6   : > { %s682_s18 = smov (%p24_p0, %s23_s18), 0  ;;  %p422_p5 = scmp.ge.s32.totalorder %s559_s16, 2 }
   0x7   : > { %p44_p3 = por %p43_p2, %p42_p1  ;;  %s31_s19 = ssub.s32 %s555_s15, %s682_s18 }
   0x8   : > { %p33_p4 = scmp.eq.s32.totalorder %s31_s19, 0  ;;  %142 = sbr.rel (%p422_p5) target bundleno = 18 (0x12), region = 24 }
   0xa   : > { %s621_s21 = scalar_select %p33_p4, %s547_s13, %s35_s20  }
   0xd   : > { %145 = sbr.rel (!%p44_p3) target bundleno = 18 (0x12), region = 28  ;;  %s147_s22 = sand.u32 (%p44_p3), 1, %s547_s13  }
   0xe   : > { %s424_s23 = sshll.u32 (%p44_p3), %s555_s15, 2  ;;  %s423_s24 = sshll.u32 (%p44_p3), %s147_s22, 3 }
   0xf   : > { %s154_s27 = scalar_lea.vmem (%p44_p3), %s672_s0, %s424_s23  ;;  %s149_s28 = scalar_lea.vmem (%p44_p3), [#allocation3], %s423_s24 }
  0x10   : > { %v171_v0 = vld [vmem:[%s154_s27] sm:$0xf] (%p44_p3)  ;;  %v173_v1 = vld [vmem:[%s154_s27 + $0x8] sm:$0xf] (%p44_p3) }
  0x11   : > { %172 = vst [vmem:[%s149_s28] sm:$0xf] (%p44_p3), %v171_v0  ;;  %174 = vst [vmem:[%s149_s28 + $0x4] sm:$0xf] (%p44_p3), %v173_v1 }
  0x12 PF: > { %p425_p6 = scmp.ge.s32.totalorder %s559_s16, 1  ;;  %p201_p7 = scmp.lt.s32.totalorder %s559_s16, 3 }
  0x14   : > { %p202_p8 = pnand %p425_p6, %p201_p7 }
  0x15   : > { %s208_s29 = sand.u32 (!%p202_p8), 1, %s543_s12   ;;  %p427_p9 = scmp.ne.s32.totalorder (!%p202_p8), %s551_s14, 0 }
  0x16   : > { %205 = sbr.rel (%p202_p8) target bundleno = 408 (0x198), region = 69  ;;  %s426_s30 = sshll.u32 (!%p202_p8), %s208_s29, 3 }
  0x17   : > { %s210_s4 = scalar_lea.vmem (!%p202_p8), [#allocation3], %s426_s30 }
  0x1b   : > { %230 = sbr.rel (%p427_p9) target bundleno = 34 (0x22), region = 77 }
  0x20   : > { %v561_v2 = vmov 0.0  }
  0x21   : > { %231 = vst [vmem:[#allocation2] sm:$0xf] %v561_v2  ;;  %232 = vst [vmem:[#allocation2 + $0x4] sm:$0xf] %v561_v2 }
  0x22 PF: > { %v233_v3 = vld [vmem:[%s210_s4] sm:$0xf]  ;;  %v234_v5 = vld [vmem:[%s210_s4 + $0x4] sm:$0xf]  ;;  %p428_p10 = scmp.ne.s32.totalorder %s551_s14, 1 }
  0x27   : > { %244 = sbr.rel (%p428_p10) target bundleno = 393 (0x189), region = 81 }
  0x28   : > { %v235_v4 = vld [vmem:[#allocation2] sm:$0xf]  ;;  %v236_v7 = vld [vmem:[#allocation2 + $0x4] sm:$0xf] }
  0x29   : > { %v237_v6 = vadd.f32 %v235_v4, %v233_v3  ;;  %v238_v8 = vadd.f32 %v236_v7, %v234_v5 }
  0x2b   : > { %239 = vst [vmem:[#allocation2] sm:$0xf] %v237_v6  ;;  %240 = vst [vmem:[#allocation2 + $0x4] sm:$0xf] %v238_v8 }
  0x2c   : > { %vm247_vm0 = vcmask 1043456   ;;  %v254_v13 = vld [vmem:[%s673_s1] sm:$0xf]  ;;  %v562_v14 = vmov 0.0   ;;  %vm563_vm1 = vmmov 0   ;;  %v264_v15 = vlaneseq }
  0x2d   : > { %438 = vmatprep.subr.mxu0 %v562_v14  ;;  %440 = vmatprep.mubr.msk.f32.mxu0 %vm563_vm1, %v562_v14  ;;  %vm274_vm2 = vcmask 1041409   ;;  %vm276_vm3 = vcmask 31744   ;;  %v429_v24 = vld [vmem:[%s674_s2] ss:$0 sm:$0xff] }
  0x2e   : > { %439 = vmatpush3.msk.msra.mxu0 %vm247_vm0, %v254_v13  ;;  %v265_v16 = vand.u32 127, %v264_v15  ;;  %v267_v17 = vshrl.u32 %v264_v15, 7 }
  0x30   : > { %v268_v19 = vsub.s32 %v265_v16, %v267_v17 }
  0x32   : > { %v245_v9 = vld [vmem:[#allocation2] sm:$0xf]  ;;  %v246_v10 = vld [vmem:[#allocation2 + $0x4] sm:$0xf] }
  0x33   : > { %v248_v11 = vsel %vm247_vm0, %v245_v9, 0.0  ;;  %v251_v12 = vsel %vm247_vm0, %v246_v10, 0.0 }
  0x34   : > { %249 = vadd.xlane.f32.xlu0 %v248_v11 }
  0x38   : > { %252 = vadd.xlane.f32.xlu0 %v251_v12 }
  0xbd   : > { %v250_v18 = vpop.xlane.xlu0 %249 }
  0xbe   : > { %v269_v21 = vrot.slane %v250_v18, %v268_v19 }
  0xc1   : > { %v253_v20 = vpop.xlane.xlu0 %252 }
  0xc2   : > { %v273_v22 = vrot.slane %v253_v20, %v268_v19 }
  0xc4   : > { %v275_v23 = vsel %vm274_vm2, %v273_v22, %v269_v21 }
  0xc5   : > { %441 = vmatmul.mubr.msk.f32.vlgmr.msra.gmra.mxu0 %vm276_vm3, %v275_v23 }
 0x185   : > { %v348_v25 = vpop.f32.mrf.mxu0 }
 0x186   : > { %v349_v26 = vadd.f32 %v429_v24, %v348_v25 }
 0x187   : > { %v442_v27 = vpop.f32.mrf.mxu0 }
 0x188   : > { %352 = vst [vmem:[#allocation4] sm:$0x3] %v349_v26 }
 0x189 PF: > { %p642_p11 = scmp.eq.s32.totalorder %s420_s17, 1  ;;  %s564_s10 = smov [#allocation4]  }
 0x18a   : > { %s362_s11 = sshll.u32 %s564_s10, 4  ;;  %s363_s11 = int_to_ptr.vmem [resolvable:$true] %s362_s11 }
 0x18b   : > { %s493_s12 = scalar_lea.vmem %s363_s11, 32  ;;  %p500_p1 = scmp.lt.s32.totalorder %s363_s11, %s363_s11 }
 0x18c   : > { %p494_p12 = scmp.ne.s32.totalorder %s363_s11, %s493_s12  ;;  %p501_p2 = scmp.lt.s32.totalorder %s493_s12, %s493_s12 }
 0x18e   : > { %p495_p13 = pnand %p494_p12, %p642_p11  ;;  %p502_p3 = por %p501_p2, %p500_p1 }
 0x190   : > { %p496_p0 = pneg %p495_p13 }
 0x192   : > { %p503_p4 = pnand %p502_p3, %p496_p0 }
 0x194   : > { %506 = shalt.err (!%p503_p4)
}
 0x195   : > { %444 = dma.vmem_to_hbm [thread:$0]  (%p642_p11), %s363_s11, 32, %s675_s3, [#allocation5]  }
 0x196   : > { %538 = dma.done.wait (%p642_p11), [#allocation5], 32  }
 0x197   : > { %540 = vsyncadd (%p642_p11), [#allocation5], 4294967264 }
 0x198 PF: > { %s14_s16 = sadd.s32 1, %s559_s16   ;;  %s677_s12 = smov %s547_s13 }
 0x199   : > { %p11_p5 = scmp.ge.s32.totalorder %s14_s16, 4   ;;  %s678_s13 = smov %s621_s21 }
 0x19a   : > { %s679_s14 = smov %s555_s15  ;;  %s680_s15 = smov %s682_s18 }
 0x19b   :  { %13 = sbr.rel (!%p11_p5) target bundleno = 3 (0x3), region = 114 }
 0x1a0   :  { %375 = vsyncpa [#allocation5], 1 }
 0x1a1   :  { %377 = vsyncpa [#allocation5 + $0x1], 1 }

</bundles_post_ra>
